<compile_context>
chip_gen: v6e
topology: v6e:2x2x1
jax: 0.10.0
libtpu: 0.0.40
codegen_flags: <defaults>
</compile_context>

<pallas_src>
import functools

import jax
import jax.numpy as jnp
from jax.experimental import pallas as pl
from jax.experimental.pallas import tpu as pltpu


def _round_up(x, m):
    return (x + m - 1) // m * m


def _tpu_vmem_capacity_bytes():
    """Per-core VMEM capacity (64 MiB on v7x, 128 MiB on v5e/v6e); conservative fallback."""
    try:
        return int(pltpu.get_tpu_info().vmem_capacity_bytes)
    except Exception:
        return 64 << 20


def _largest_f_tile(f128, cap):
    """Largest multiple of 128 that divides f128 and is <= cap (min 128)."""
    n = f128 // 128
    best = 1
    for d in range(1, n + 1):
        if n % d == 0 and 128 * d <= cap:
            best = d
    return 128 * best


def _ffn_kernel(x_ref, w1_ref, b1_ref, w2_ref, b2_ref, o_ref, acc_ref):
    f = pl.program_id(1)

    @pl.when(f == 0)
    def _init():
        acc_ref[...] = jnp.zeros_like(acc_ref)

    # layer1 partial: x @ W1[:, f_tile] + b1[f_tile]   (MXU, f32 accumulate)
    h = jnp.dot(x_ref[...], w1_ref[...], preferred_element_type=jnp.float32)
    h = jnp.maximum(h + b1_ref[...].astype(jnp.float32), 0.0)  # ReLU (dropout = identity)

    # layer2 partial: acc += relu(.) @ W2[f_tile, :]    (f32 VMEM accumulator)
    acc_ref[...] += jnp.dot(h.astype(w2_ref.dtype), w2_ref[...],
                            preferred_element_type=jnp.float32)

    @pl.when(f == pl.num_programs(1) - 1)
    def _finalize():
        # b2 added exactly once, on the last reduction step (dropout = identity).
        o_ref[...] = (acc_ref[...] + b2_ref[...].astype(jnp.float32)).astype(o_ref.dtype)


@functools.partial(jax.jit, static_argnames=("block_m", "block_f", "compute_dtype"))
def feed_forward_network(x, w1, b1, w2, b2, *, block_m=None, block_f=None,
                         compute_dtype=None):
    """Inference-mode FFN: relu(x @ w1 + b1) @ w2 + b2  (dropout == identity).

    x: [B, S, H]; w1: [H, F]; b1: [F]; w2: [F, H]; b2: [H]  ->  [B, S, H].
    Weights are stored [in_features, out_features] (transposed vs nn.Linear.weight).
    """
    B, S, H = x.shape
    F = w1.shape[1]
    M = B * S

    out_dtype = x.dtype
    if compute_dtype is not None:
        # bf16 MXU operands: ~2-4x matmul rate, half the weight HBM/VMEM bytes.
        x, w1, w2 = (a.astype(compute_dtype) for a in (x, w1, w2))

    isz_x = jnp.dtype(x.dtype).itemsize
    isz_w = jnp.dtype(w1.dtype).itemsize

    # ---- chip-aware budgets --------------------------------------------------
    vmem_cap = _tpu_vmem_capacity_bytes()
    vmem_budget = vmem_cap - (8 << 20)          # headroom for Mosaic internal scratch

    # ---- padded / tiled geometry ---------------------------------------------
    Hp = _round_up(H, 128)                      # lane-dense last dims everywhere
    F128 = _round_up(F, 128)

    if block_m is None:
        # Weight-stream arithmetic intensity ~ 2*tm/itemsize flop/byte per M tile:
        # bf16 on a 128-MiB-VMEM chip -> tm=1024 clears v6e's ~660 flop/B roofline;
        # otherwise (f32, or 64-MiB v7x) stay at 512.
        block_m = 1024 if (isz_x <= 2 and vmem_cap > (64 << 20)) else 512
    if block_f is None:
        if 4 * Hp * F128 * isz_w <= (16 << 20):  # W1+W2, double-buffered, small enough
            block_f = F128                       # collapse F: weights DMA'd once per call
        elif vmem_cap <= (64 << 20):
            block_f = 256                        # v7x: keep streams inside 64 MiB
        else:
            block_f = 512

    tf = _largest_f_tile(F128, block_f)          # divides F128 -> no wasted F steps
    Fp = F128
    n_f = Fp // tf

    M16 = _round_up(M, 16)                       # 16-row granularity (bf16-safe sublanes)
    tm = min(block_m, M16)
    if n_f == 1 and M16 <= tm and M16 >= 32:
        # Weights resident for the whole call: split M so megacore chips get >=2
        # parallel steps at zero extra weight traffic.
        tm = 16 * ((M16 // 16 + 1) // 2)

    # ---- shrink-to-fit: double-buffered streams + f32 acc within VMEM ---------
    def vmem_est(tm_, tf_):
        return (2 * tm_ * Hp * isz_x                          # x tile (double-buffered)
                + 2 * tm_ * Hp * isz_x                        # out tile
                + 2 * (Hp * tf_ + tf_ * Hp + tf_ + Hp) * isz_w  # W1, W2, b1, b2 streams
                + tm_ * Hp * 4)                               # f32 accumulator

    while vmem_est(tm, tf) > vmem_budget and tf > 128:
        tf = _largest_f_tile(F128, tf - 128)
    while vmem_est(tm, tf) > vmem_budget and tm > 16:
        tm = max(16, _round_up(tm // 2, 16))

    Mp = _round_up(M, tm)
    n_m, n_f = Mp // tm, Fp // tf

    # ---- padding (skipped entirely when already aligned) ----------------------
    # NOTE: for production, pre-pad/cache the padded weights once outside the
    # per-call path; here we only pad when H/F are not 128-aligned.
    x2d = x.reshape(M, H)
    if (Mp, Hp) != (M, H):
        x2d = jnp.pad(x2d, ((0, Mp - M), (0, Hp - H)))
    w1p = w1 if (Hp, Fp) == (H, F) else jnp.pad(w1, ((0, Hp - H), (0, Fp - F)))
    w2p = w2 if (Fp, Hp) == (F, H) else jnp.pad(w2, ((0, Fp - F), (0, Hp - H)))
    b1p = (b1 if Fp == F else jnp.pad(b1, (0, Fp - F))).reshape(1, Fp)
    b2p = (b2 if Hp == H else jnp.pad(b2, (0, Hp - H))).reshape(1, Hp)

    vmem_limit = int(min(max(vmem_est(tm, tf) + (4 << 20), 32 << 20), vmem_budget))

    cost = pl.CostEstimate(
        flops=int(4 * Mp * Fp * Hp),             # two matmuls
        transcendentals=0,
        bytes_accessed=int(2 * Mp * Hp * isz_x
                           + (n_m if n_f > 1 else 1)
                           * (Hp * Fp + Fp * Hp + Fp + Hp) * isz_w))

    out2d = pl.pallas_call(
        _ffn_kernel,
        out_shape=jax.ShapeDtypeStruct((Mp, Hp), out_dtype),
        grid_spec=pltpu.PrefetchScalarGridSpec(
            num_scalar_prefetch=0,
            grid=(n_m, n_f),                                   # (M parallel, F reduction)
            in_specs=[
                pl.BlockSpec((tm, Hp), lambda i, f: (i, 0)),   # x tile (resident over f)
                pl.BlockSpec((Hp, tf), lambda i, f: (0, f)),   # W1 column tile (streamed)
                pl.BlockSpec((1, tf), lambda i, f: (0, f)),    # b1 tile
                pl.BlockSpec((tf, Hp), lambda i, f: (f, 0)),   # W2 row tile (streamed)
                pl.BlockSpec((1, Hp), lambda i, f: (0, 0)),    # b2 (grid-invariant, tiny)
            ],
            out_specs=pl.BlockSpec((tm, Hp), lambda i, f: (i, 0)),
            scratch_shapes=[pltpu.VMEM((tm, Hp), jnp.float32)],
        ),
        compiler_params=pltpu.CompilerParams(
            dimension_semantics=("parallel", "arbitrary"),
            vmem_limit_bytes=vmem_limit),
        cost_estimate=cost,
    )(x2d, w1p, b1p, w2p, b2p)

    return out2d[:M, :H].reshape(B, S, H)


def _reference(x, w1, b1, w2, b2):
    h = jnp.maximum(jnp.dot(x, w1) + b1, 0.0)
    return jnp.dot(h, w2) + b2


if __name__ == "__main__":
    # Small, deterministic setup: batch=2, seq=8, hidden=32, filter=64.
    B, S, H, F = 2, 8, 32, 64
    key = jax.random.PRNGKey(0)
    kx, k1, kb1, k2, kb2 = jax.random.split(key, 5)

    x = jax.random.normal(kx, (B, S, H), dtype=jnp.float32)

    # PyTorch nn.Linear default init: U(-1/sqrt(in), 1/sqrt(in)).
    lim1 = 1.0 / (H ** 0.5)
    lim2 = 1.0 / (F ** 0.5)
    w1 = jax.random.uniform(k1, (H, F), jnp.float32, -lim1, lim1)
    b1 = jax.random.uniform(kb1, (F,), jnp.float32, -lim1, lim1)
    w2 = jax.random.uniform(k2, (F, H), jnp.float32, -lim2, lim2)
    b2 = jax.random.uniform(kb2, (H,), jnp.float32, -lim2, lim2)

    out = feed_forward_network(x, w1, b1, w2, b2)
    out = jax.block_until_ready(out)

    ref = _reference(x, w1, b1, w2, b2)
    assert out.shape == (B, S, H)
    assert jnp.allclose(out, ref, atol=1e-5, rtol=1e-5), "mismatch vs reference"

    print("KERNEL_OK")
</pallas_src>

<mosaic_0001>
module attributes {stable_mosaic.version = 11 : i64} {
  func.func @_ffn_kernel(%arg0: i32, %arg1: i32, %arg2: memref<16x128xf32, #tpu.memory_space<vmem>>, %arg3: memref<128x128xf32, #tpu.memory_space<vmem>>, %arg4: memref<1x128xf32, #tpu.memory_space<vmem>>, %arg5: memref<128x128xf32, #tpu.memory_space<vmem>>, %arg6: memref<1x128xf32, #tpu.memory_space<vmem>>, %arg7: memref<16x128xf32, #tpu.memory_space<vmem>>, %arg8: memref<16x128xf32, #tpu.memory_space<vmem>>) attributes {dimension_semantics = [#tpu.dimension_semantics<parallel>, #tpu.dimension_semantics<arbitrary>], iteration_bounds = array<i64: 1, 1>, scalar_prefetch = 0 : i64, scratch_operands = 1 : i64, tpu.core_type = #tpu.core_type<tc>, window_params = [{transform_indices = @transform_0, window_bounds = array<i64: 16, 128>}, {transform_indices = @transform_1, window_bounds = array<i64: 128, 128>}, {transform_indices = @transform_2, window_bounds = array<i64: 1, 128>}, {transform_indices = @transform_3, window_bounds = array<i64: 128, 128>}, {pipeline_mode = #tpu.pipeline_mode<synchronous>, transform_indices = @transform_4, window_bounds = array<i64: 1, 128>}, {transform_indices = @transform_5, window_bounds = array<i64: 16, 128>}]} {
    %c0_i32 = arith.constant 0 : i32
    %0 = arith.cmpi eq, %arg1, %c0_i32 : i32
    %1 = arith.extui %0 : i1 to i32
    %c0_i32_0 = arith.constant 0 : i32
    %2 = arith.cmpi ne, %1, %c0_i32_0 : i32
    scf.if %2 {
      %cst_16 = arith.constant 0.000000e+00 : f32
      %19 = vector.broadcast %cst_16 : f32 to vector<16x128xf32>
      %c0_17 = arith.constant 0 : index
      %c0_18 = arith.constant 0 : index
      %20 = vector.load %arg8[%c0_17, %c0_18] : memref<16x128xf32, #tpu.memory_space<vmem>>, vector<16x128xf32>
      tpu.vector_store %arg8[%c0_17, %c0_18], %19 {strides = array<i32>} : memref<16x128xf32, #tpu.memory_space<vmem>>, vector<16x128xf32>,
    } else {
    }
    %c0 = arith.constant 0 : index
    %c0_1 = arith.constant 0 : index
    %3 = vector.load %arg2[%c0, %c0_1] : memref<16x128xf32, #tpu.memory_space<vmem>>, vector<16x128xf32>
    %c0_2 = arith.constant 0 : index
    %c0_3 = arith.constant 0 : index
    %4 = vector.load %arg3[%c0_2, %c0_3] : memref<128x128xf32, #tpu.memory_space<vmem>>, vector<128x128xf32>
    %cst = arith.constant dense<0.000000e+00> : vector<16x128xf32>
    %5 = tpu.matmul %3, %4, %cst {dimension_numbers = #tpu.dot_dimension_numbers<[1], [0], [0], [1], [0, 0, 1, 1], [], []>} : vector<16x128xf32>, vector<128x128xf32>, vector<16x128xf32> -> vector<16x128xf32>
    %c0_4 = arith.constant 0 : index
    %c0_5 = arith.constant 0 : index
    %6 = vector.load %arg4[%c0_4, %c0_5] : memref<1x128xf32, #tpu.memory_space<vmem>>, vector<1x128xf32>
    %7 = vector.broadcast %6 : vector<1x128xf32> to vector<16x128xf32>
    %8 = arith.addf %5, %7 : vector<16x128xf32>
    %cst_6 = arith.constant 0.000000e+00 : f32
    %9 = vector.broadcast %cst_6 : f32 to vector<16x128xf32>
    %10 = arith.maximumf %8, %9 : vector<16x128xf32>
    %c0_7 = arith.constant 0 : index
    %c0_8 = arith.constant 0 : index
    %11 = vector.load %arg8[%c0_7, %c0_8] : memref<16x128xf32, #tpu.memory_space<vmem>>, vector<16x128xf32>
    %c0_9 = arith.constant 0 : index
    %c0_10 = arith.constant 0 : index
    %12 = vector.load %arg5[%c0_9, %c0_10] : memref<128x128xf32, #tpu.memory_space<vmem>>, vector<128x128xf32>
    %cst_11 = arith.constant dense<0.000000e+00> : vector<16x128xf32>
    %13 = tpu.matmul %10, %12, %cst_11 {dimension_numbers = #tpu.dot_dimension_numbers<[1], [0], [0], [1], [0, 0, 1, 1], [], []>} : vector<16x128xf32>, vector<128x128xf32>, vector<16x128xf32> -> vector<16x128xf32>
    %14 = arith.addf %11, %13 : vector<16x128xf32>
    %c0_12 = arith.constant 0 : index
    %c0_13 = arith.constant 0 : index
    %15 = vector.load %arg8[%c0_12, %c0_13] : memref<16x128xf32, #tpu.memory_space<vmem>>, vector<16x128xf32>
    tpu.vector_store %arg8[%c0_12, %c0_13], %14 {strides = array<i32>} : memref<16x128xf32, #tpu.memory_space<vmem>>, vector<16x128xf32>,
    %c0_i32_14 = arith.constant 0 : i32
    %16 = arith.cmpi eq, %arg1, %c0_i32_14 : i32
    %17 = arith.extui %16 : i1 to i32
    %c0_i32_15 = arith.constant 0 : i32
    %18 = arith.cmpi ne, %17, %c0_i32_15 : i32
    scf.if %18 {
      %c0_16 = arith.constant 0 : index
      %c0_17 = arith.constant 0 : index
      %19 = vector.load %arg8[%c0_16, %c0_17] : memref<16x128xf32, #tpu.memory_space<vmem>>, vector<16x128xf32>
      %c0_18 = arith.constant 0 : index
      %c0_19 = arith.constant 0 : index
      %20 = vector.load %arg6[%c0_18, %c0_19] : memref<1x128xf32, #tpu.memory_space<vmem>>, vector<1x128xf32>
      %21 = vector.broadcast %20 : vector<1x128xf32> to vector<16x128xf32>
      %22 = arith.addf %19, %21 : vector<16x128xf32>
      %c0_20 = arith.constant 0 : index
      %c0_21 = arith.constant 0 : index
      %23 = vector.load %arg7[%c0_20, %c0_21] : memref<16x128xf32, #tpu.memory_space<vmem>>, vector<16x128xf32>
      tpu.vector_store %arg7[%c0_20, %c0_21], %22 {strides = array<i32>} : memref<16x128xf32, #tpu.memory_space<vmem>>, vector<16x128xf32>,
    } else {
    }
    return
  }
  func.func @transform_0(%arg0: i32, %arg1: i32) -> (i32, i32) {
    %c0_i32 = arith.constant 0 : i32
    %c0_i32_0 = arith.constant 0 : i32
    return %arg0, %c0_i32 : i32, i32
  }
  func.func @transform_1(%arg0: i32, %arg1: i32) -> (i32, i32) {
    %c0_i32 = arith.constant 0 : i32
    %c0_i32_0 = arith.constant 0 : i32
    return %c0_i32, %arg1 : i32, i32
  }
  func.func @transform_2(%arg0: i32, %arg1: i32) -> (i32, i32) {
    %c0_i32 = arith.constant 0 : i32
    %c0_i32_0 = arith.constant 0 : i32
    return %c0_i32, %arg1 : i32, i32
  }
  func.func @transform_3(%arg0: i32, %arg1: i32) -> (i32, i32) {
    %c0_i32 = arith.constant 0 : i32
    %c0_i32_0 = arith.constant 0 : i32
    return %arg1, %c0_i32 : i32, i32
  }
  func.func @transform_4(%arg0: i32, %arg1: i32) -> (i32, i32) {
    %c0_i32 = arith.constant 0 : i32
    %c0_i32_0 = arith.constant 0 : i32
    %c0_i32_1 = arith.constant 0 : i32
    return %c0_i32, %c0_i32_0 : i32, i32
  }
  func.func @transform_5(%arg0: i32, %arg1: i32) -> (i32, i32) {
    %c0_i32 = arith.constant 0 : i32
    %c0_i32_0 = arith.constant 0 : i32
    return %arg0, %c0_i32 : i32, i32
  }
}

</mosaic_0001>

<bundles_post_ra>
// kernel: feed_forward_network.1
= control target key start
LH: loop header
LB: loop body
LE: loop exit
PB: predicated region body
PF: predicated region fallthrough
CT: control target
= control target key end

     0   :  { %s497_s1 = inlined_call_operand.vmem [shape: f32[128,128], index: 1, kind: input, shape index: {}]   ;;  %s498_s0 = inlined_call_operand.vmem [shape: f32[16,128], index: 0, kind: input, shape index: {}]   ;;  %s499_s3 = inlined_call_operand.vmem [shape: f32[128,128], index: 3, kind: input, shape index: {}]   ;;  %s500_s2 = inlined_call_operand.vmem [shape: f32[1,128], index: 2, kind: input, shape index: {}]   ;;  %s501_s4 = inlined_call_operand.vmem [shape: f32[1,128], index: 4, kind: input, shape index: {}]   ;;  %s502_s5 = inlined_call_operand.vmem [shape: f32[16,128], index: 5, kind: output, shape index: {}]  }
   0x1   :  { %v43_v0 = vld [vmem:[%s497_s1 + $0x78] sm:$0xff]  ;;  %v42_v1 = vld [vmem:[%s497_s1 + $0x70] sm:$0xff]  ;;  %v41_v2 = vld [vmem:[%s497_s1 + $0x68] sm:$0xff] }
   0x2   :  { %283 = vmatprep.subr.mxu0 %v43_v0  ;;  %v40_v3 = vld [vmem:[%s497_s1 + $0x60] sm:$0xff]  ;;  %v39_v5 = vld [vmem:[%s497_s1 + $0x58] sm:$0xff]  ;;  %v144_v7 = vld [vmem:[%s499_s3 + $0x70] sm:$0xff] }
   0x3   :  { %284 = vmatpush3.msra.mxu0 %v43_v0  ;;  %v26_v4 = vld [vmem:[%s498_s0] sm:$0xff]  ;;  %v145_v6 = vld [vmem:[%s499_s3 + $0x78] sm:$0xff]  ;;  %v38_v8 = vld [vmem:[%s497_s1 + $0x50] sm:$0xff] }
   0x4   :  { %285 = vmatprep.subr.mxu0 %v42_v1  ;;  %315 = vmatprep.mubr.f32.mxu0 %v26_v4  ;;  %v143_v9 = vld [vmem:[%s499_s3 + $0x68] sm:$0xff]  ;;  %v142_v11 = vld [vmem:[%s499_s3 + $0x60] sm:$0xff]  ;;  %v141_v13 = vld [vmem:[%s499_s3 + $0x58] sm:$0xff] }
   0x5   :  { %286 = vmatpush3.msra.mxu0 %v42_v1  ;;  %318 = vmatprep.subr.mxu1 %v145_v6  ;;  %v37_v10 = vld [vmem:[%s497_s1 + $0x48] sm:$0xff]  ;;  %v36_v12 = vld [vmem:[%s497_s1 + $0x40] sm:$0xff]  ;;  %v35_v14 = vld [vmem:[%s497_s1 + $0x38] sm:$0xff] }
   0x6   :  { %287 = vmatprep.subr.mxu0 %v41_v2  ;;  %319 = vmatpush3.msra.mxu1 %v145_v6  ;;  %v140_v15 = vld [vmem:[%s499_s3 + $0x50] sm:$0xff]  ;;  %v139_v17 = vld [vmem:[%s499_s3 + $0x48] sm:$0xff]  ;;  %v138_v19 = vld [vmem:[%s499_s3 + $0x40] sm:$0xff] }
   0x7   :  { %288 = vmatpush3.msra.mxu0 %v41_v2  ;;  %320 = vmatprep.subr.mxu1 %v144_v7  ;;  %v34_v16 = vld [vmem:[%s497_s1 + $0x30] sm:$0xff]  ;;  %v33_v18 = vld [vmem:[%s497_s1 + $0x28] sm:$0xff]  ;;  %v32_v20 = vld [vmem:[%s497_s1 + $0x20] sm:$0xff] }
   0x8   :  { %289 = vmatprep.subr.mxu0 %v40_v3  ;;  %321 = vmatpush3.msra.mxu1 %v144_v7  ;;  %v137_v21 = vld [vmem:[%s499_s3 + $0x38] sm:$0xff]  ;;  %v136_v23 = vld [vmem:[%s499_s3 + $0x30] sm:$0xff]  ;;  %v135_v25 = vld [vmem:[%s499_s3 + $0x28] sm:$0xff] }
   0x9   :  { %290 = vmatpush3.msra.mxu0 %v40_v3  ;;  %322 = vmatprep.subr.mxu1 %v143_v9  ;;  %v31_v22 = vld [vmem:[%s497_s1 + $0x18] sm:$0xff]  ;;  %v30_v24 = vld [vmem:[%s497_s1 + $0x10] sm:$0xff]  ;;  %v29_v26 = vld [vmem:[%s497_s1 + $0x8] sm:$0xff] }
   0xa   :  { %291 = vmatprep.subr.mxu0 %v39_v5  ;;  %323 = vmatpush3.msra.mxu1 %v143_v9  ;;  %v134_v27 = vld [vmem:[%s499_s3 + $0x20] sm:$0xff]  ;;  %v27_v29 = vld [vmem:[%s498_s0 + $0x8] sm:$0xff]  ;;  %v133_v30 = vld [vmem:[%s499_s3 + $0x18] sm:$0xff] }
   0xb   :  { %292 = vmatpush3.msra.mxu0 %v39_v5  ;;  %324 = vmatprep.subr.mxu1 %v142_v11  ;;  %v28_v28 = vld [vmem:[%s497_s1] sm:$0xff]  ;;  %v132_v31 = vld [vmem:[%s499_s3 + $0x10] sm:$0xff]  ;;  %v131_v32 = vld [vmem:[%s499_s3 + $0x8] sm:$0xff] }
   0xc   :  { %293 = vmatprep.subr.mxu0 %v38_v8  ;;  %325 = vmatpush3.msra.mxu1 %v142_v11  ;;  %v130_v33 = vld [vmem:[%s499_s3] sm:$0xff] }
   0xd   :  { %294 = vmatpush3.msra.mxu0 %v38_v8  ;;  %326 = vmatprep.subr.mxu1 %v141_v13  ;;  %v245_v34 = vld [vmem:[%s500_s2] ss:$0 sm:$0xff] }
   0xe   :  { %295 = vmatprep.subr.mxu0 %v37_v10  ;;  %327 = vmatpush3.msra.mxu1 %v141_v13  ;;  %v246_v41 = vld [vmem:[%s501_s4] ss:$0 sm:$0xff] }
   0xf   :  { %296 = vmatpush3.msra.mxu0 %v37_v10  ;;  %328 = vmatprep.subr.mxu1 %v140_v15 }
  0x10   :  { %297 = vmatprep.subr.mxu0 %v36_v12  ;;  %329 = vmatpush3.msra.mxu1 %v140_v15 }
  0x11   :  { %298 = vmatpush3.msra.mxu0 %v36_v12  ;;  %330 = vmatprep.subr.mxu1 %v139_v17 }
  0x12   :  { %299 = vmatprep.subr.mxu0 %v35_v14  ;;  %331 = vmatpush3.msra.mxu1 %v139_v17 }
  0x13   :  { %300 = vmatpush3.msra.mxu0 %v35_v14  ;;  %332 = vmatprep.subr.mxu1 %v138_v19 }
  0x14   :  { %301 = vmatprep.subr.mxu0 %v34_v16  ;;  %333 = vmatpush3.msra.mxu1 %v138_v19 }
  0x15   :  { %302 = vmatpush3.msra.mxu0 %v34_v16  ;;  %334 = vmatprep.subr.mxu1 %v137_v21 }
  0x16   :  { %303 = vmatprep.subr.mxu0 %v33_v18  ;;  %335 = vmatpush3.msra.mxu1 %v137_v21 }
  0x17   :  { %304 = vmatpush3.msra.mxu0 %v33_v18  ;;  %336 = vmatprep.subr.mxu1 %v136_v23 }
  0x18   :  { %305 = vmatprep.subr.mxu0 %v32_v20  ;;  %337 = vmatpush3.msra.mxu1 %v136_v23 }
  0x19   :  { %306 = vmatpush3.msra.mxu0 %v32_v20  ;;  %338 = vmatprep.subr.mxu1 %v135_v25 }
  0x1a   :  { %307 = vmatprep.subr.mxu0 %v31_v22  ;;  %339 = vmatpush3.msra.mxu1 %v135_v25 }
  0x1b   :  { %308 = vmatpush3.msra.mxu0 %v31_v22  ;;  %340 = vmatprep.subr.mxu1 %v134_v27 }
  0x1c   :  { %309 = vmatprep.subr.mxu0 %v30_v24  ;;  %341 = vmatpush3.msra.mxu1 %v134_v27 }
  0x1d   :  { %310 = vmatpush3.msra.mxu0 %v30_v24  ;;  %342 = vmatprep.subr.mxu1 %v133_v30 }
  0x1e   :  { %311 = vmatprep.subr.mxu0 %v29_v26  ;;  %343 = vmatpush3.msra.mxu1 %v133_v30 }
  0x1f   :  { %312 = vmatpush3.msra.mxu0 %v29_v26  ;;  %344 = vmatprep.subr.mxu1 %v132_v31 }
  0x20   :  { %313 = vmatprep.subr.mxu0 %v28_v28  ;;  %345 = vmatpush3.msra.mxu1 %v132_v31 }
  0x21   :  { %314 = vmatpush3.msra.mxu0 %v28_v28  ;;  %346 = vmatprep.subr.mxu1 %v131_v32 }
  0x22   :  { %316 = vmatmul.mubr.f32.vlgmr.msra.gmra.mxu0 %v27_v29  ;;  %347 = vmatpush3.msra.mxu1 %v131_v32 }
  0x23   :  { %348 = vmatprep.subr.mxu1 %v130_v33 }
  0x24   :  { %349 = vmatpush3.msra.mxu1 %v130_v33 }
  0xe2   :  { %v317_v35 = vpop.f32.mrf.mxu0 }
  0xe3   :  { %v123_v36 = vadd.f32 %v317_v35, %v245_v34 }
  0xe4   :  { %v117_v37 = vpop.f32.mrf.mxu0 }
  0xe5   :  { %v118_v38 = vadd.f32 %v245_v34, %v117_v37  ;;  %v127_v40 = vmax.f32 %v123_v36, 0.0 }
  0xe7   :  { %v126_v39 = vmax.f32 %v118_v38, 0.0 }
  0xe9   :  { %350 = vmatprep.mubr.f32.mxu1 %v126_v39 }
  0xea   :  { %351 = vmatmul.mubr.f32.vlgmr.msra.gmra.mxu1 %v127_v40 }
 0x1aa   :  { %v352_v42 = vpop.f32.mrf.mxu1 }
 0x1ab   :  { %v238_v43 = vadd.f32 %v352_v42, %v246_v41 }
 0x1ac   :  { %v212_v44 = vpop.f32.mrf.mxu1 }
 0x1ad   :  { %240 = vst [vmem:[%s502_s5 + $0x8] sm:$0xff] %v238_v43  ;;  %v237_v45 = vadd.f32 %v246_v41, %v212_v44 }
 0x1af   :  { %239 = vst [vmem:[%s502_s5] sm:$0xff] %v237_v45 }

</bundles_post_ra>
